<compile_context>
chip_gen: v6e
topology: v6e:2x2x1
jax: 0.10.0
libtpu: 0.0.40
codegen_flags: <defaults>
</compile_context>

<pallas_src>
import jax
import jax.numpy as jnp
from jax.experimental import pallas as pl
from jax.experimental.pallas import tpu as pltpu

LANE = 128        # TPU lane width
SUBLANE = 8
NEG_INF = -1e30   # bias for padded output classes


def _round_up(n, m):
    return ((n + m - 1) // m) * m


def mlp_kernel(x_ref,
               w1_ref, b1_ref,
               w2_ref, b2_ref,
               w3_ref, b3_ref,
               w4_ref, b4_ref,
               out_ref):
    """One batch tile: 3x (Linear+ReLU) -> Linear -> LogSoftmax over 128 lanes."""
    h = jnp.dot(x_ref[...], w1_ref[...], preferred_element_type=jnp.float32)
    h = jnp.maximum(h + b1_ref[...], 0.0).astype(jnp.bfloat16)

    h = jnp.dot(h, w2_ref[...], preferred_element_type=jnp.float32)
    h = jnp.maximum(h + b2_ref[...], 0.0).astype(jnp.bfloat16)

    h = jnp.dot(h, w3_ref[...], preferred_element_type=jnp.float32)
    h = jnp.maximum(h + b3_ref[...], 0.0).astype(jnp.bfloat16)

    logits = jnp.dot(h, w4_ref[...], preferred_element_type=jnp.float32) + b4_ref[...]

    # Numerically stable log-softmax over the (padded) class axis. The padded
    # classes carry a -1e30 bias, so exp(shifted) == 0 there and the result
    # for the real classes is identical to a 10-wide log-softmax.
    m = jnp.max(logits, axis=-1, keepdims=True)
    shifted = logits - m
    lse = jnp.log(jnp.sum(jnp.exp(shifted), axis=-1, keepdims=True))
    out_ref[...] = (shifted - lse).astype(out_ref.dtype)


def simple_mlp_forward(x_nchw, params, *, block_batch=1024):
    """x_nchw: (B, 1, 28, 28) float32. Returns (B, 10) log-probabilities (f32)."""
    (w1, b1), (w2, b2), (w3, b3), (w4, b4) = params
    B = x_nchw.shape[0]
    in_dim = w1.shape[0]
    hid1, hid2, hid3 = w1.shape[1], w2.shape[1], w3.shape[1]
    out_dim = w4.shape[1]

    in_pad = _round_up(in_dim, LANE)                 # 784 -> 896
    out_pad = _round_up(max(out_dim, LANE), LANE)    # 10  -> 128

    # ---- pad + cast parameters (zero rows/cols are mathematically inert) ----
    w1p = jnp.zeros((in_pad, hid1), jnp.float32).at[:in_dim].set(w1).astype(jnp.bfloat16)
    w2p = w2.astype(jnp.bfloat16)
    w3p = w3.astype(jnp.bfloat16)
    w4p = jnp.zeros((hid3, out_pad), jnp.float32).at[:, :out_dim].set(w4).astype(jnp.bfloat16)
    b1p = b1.astype(jnp.float32).reshape(1, hid1)
    b2p = b2.astype(jnp.float32).reshape(1, hid2)
    b3p = b3.astype(jnp.float32).reshape(1, hid3)
    b4p = jnp.full((1, out_pad), NEG_INF, jnp.float32).at[:, :out_dim].set(
        b4.astype(jnp.float32).reshape(1, out_dim))

    # ---- flatten, pad features + batch, cast activation stream to bf16 ----
    x = x_nchw.reshape(B, -1)
    tb = min(block_batch, _round_up(B, 2 * SUBLANE))  # batch tile (multiple of 16)
    b_pad = _round_up(B, tb)
    x = jnp.pad(x, ((0, b_pad - B), (0, in_pad - in_dim))).astype(jnp.bfloat16)

    grid = (b_pad // tb,)
    resident = lambda i: (0, 0)  # weights/biases: same block every step -> stay in VMEM

    flops = 2 * b_pad * (in_pad * hid1 + hid1 * hid2 + hid2 * hid3 + hid3 * out_pad)
    bytes_accessed = (x.size * 2 + b_pad * out_pad * 4
                      + 2 * (w1p.size + w2p.size + w3p.size + w4p.size)
                      + 4 * (b1p.size + b2p.size + b3p.size + b4p.size))

    out = pl.pallas_call(
        mlp_kernel,
        out_shape=jax.ShapeDtypeStruct((b_pad, out_pad), jnp.float32),
        grid=grid,
        in_specs=[
            pl.BlockSpec((tb, in_pad), lambda i: (i, 0)),   # x tile (pipelined)
            pl.BlockSpec((in_pad, hid1), resident),
            pl.BlockSpec((1, hid1), resident),
            pl.BlockSpec((hid1, hid2), resident),
            pl.BlockSpec((1, hid2), resident),
            pl.BlockSpec((hid2, hid3), resident),
            pl.BlockSpec((1, hid3), resident),
            pl.BlockSpec((hid3, out_pad), resident),
            pl.BlockSpec((1, out_pad), resident),
        ],
        out_specs=pl.BlockSpec((tb, out_pad), lambda i: (i, 0)),
        compiler_params=pltpu.CompilerParams(
            dimension_semantics=("parallel",)),
        cost_estimate=pl.CostEstimate(
            flops=flops,
            transcendentals=b_pad * (out_pad + 1),
            bytes_accessed=bytes_accessed),
    )(x, w1p, b1p, w2p, b2p, w3p, b3p, w4p, b4p)

    return out[:B, :out_dim]


def init_params(key, input_size=28 * 28, hidden_layers=(256, 256, 256), output_size=10):
    """Deterministic synthetic parameters. Weights stored as (in, out)."""
    sizes = [input_size, *hidden_layers, output_size]
    params = []
    for i in range(len(sizes) - 1):
        key, kw, kb = jax.random.split(key, 3)
        fan_in, fan_out = sizes[i], sizes[i + 1]
        bound = 1.0 / jnp.sqrt(fan_in)
        w = jax.random.uniform(kw, (fan_in, fan_out), jnp.float32, -bound, bound)
        b = jax.random.uniform(kb, (1, fan_out), jnp.float32, -bound, bound)
        params.append((w, b))
    return params


def reference_forward_f32(x_nchw, params):
    """Pure-JAX f32 reference of the original module semantics."""
    h = x_nchw.reshape(x_nchw.shape[0], -1)
    for w, b in params[:-1]:
        h = jnp.maximum(h @ w + b.reshape(1, -1), 0.0)
    w, b = params[-1]
    return jax.nn.log_softmax(h @ w + b.reshape(1, -1), axis=1)


def reference_forward_bf16(x_nchw, params):
    """Pure-JAX reference using the kernel's numerics (bf16 operands, f32 accum)."""
    h = x_nchw.reshape(x_nchw.shape[0], -1).astype(jnp.bfloat16)
    for w, b in params[:-1]:
        z = jnp.dot(h, w.astype(jnp.bfloat16), preferred_element_type=jnp.float32)
        h = jnp.maximum(z + b.reshape(1, -1), 0.0).astype(jnp.bfloat16)
    w, b = params[-1]
    logits = jnp.dot(h, w.astype(jnp.bfloat16),
                     preferred_element_type=jnp.float32) + b.reshape(1, -1)
    return jax.nn.log_softmax(logits, axis=1)


if __name__ == "__main__":
    key = jax.random.PRNGKey(0)
    kx, kp = jax.random.split(key)

    # Small example consistent with the module: batch=2 MNIST-shaped images.
    x = jax.random.normal(kx, (2, 1, 28, 28), jnp.float32)
    params = init_params(kp)

    out = jax.block_until_ready(simple_mlp_forward(x, params))
    assert out.shape == (2, 10)

    # Tight check against a reference with identical numerics (bf16/f32-accum).
    ref_bf16 = reference_forward_bf16(x, params)
    assert jnp.allclose(out, ref_bf16, atol=5e-3, rtol=5e-3), "mismatch vs bf16 reference"

    # Loose sanity check against the pure-f32 original semantics.
    ref_f32 = reference_forward_f32(x, params)
    assert jnp.allclose(out, ref_f32, atol=2.5e-1, rtol=2.5e-1), "mismatch vs f32 reference"

    # Log-probabilities must normalize.
    assert jnp.allclose(jnp.exp(out).sum(axis=1), 1.0, atol=1e-3)

    print("KERNEL_OK")
</pallas_src>

<mosaic_0001>
module attributes {stable_mosaic.version = 11 : i64} {
  func.func @mlp_kernel(%arg0: i32, %arg1: memref<16x896xbf16, #tpu.memory_space<vmem>>, %arg2: memref<896x256xbf16, #tpu.memory_space<vmem>>, %arg3: memref<1x256xf32, #tpu.memory_space<vmem>>, %arg4: memref<256x256xbf16, #tpu.memory_space<vmem>>, %arg5: memref<1x256xf32, #tpu.memory_space<vmem>>, %arg6: memref<256x256xbf16, #tpu.memory_space<vmem>>, %arg7: memref<1x256xf32, #tpu.memory_space<vmem>>, %arg8: memref<256x128xbf16, #tpu.memory_space<vmem>>, %arg9: memref<1x128xf32, #tpu.memory_space<vmem>>, %arg10: memref<16x128xf32, #tpu.memory_space<vmem>>) attributes {dimension_semantics = [#tpu.dimension_semantics<parallel>], iteration_bounds = array<i64: 1>, scalar_prefetch = 0 : i64, scratch_operands = 0 : i64, tpu.core_type = #tpu.core_type<tc>, window_params = [{transform_indices = @transform_0, window_bounds = array<i64: 16, 896>}, {pipeline_mode = #tpu.pipeline_mode<synchronous>, transform_indices = @transform_1, window_bounds = array<i64: 896, 256>}, {pipeline_mode = #tpu.pipeline_mode<synchronous>, transform_indices = @transform_2, window_bounds = array<i64: 1, 256>}, {pipeline_mode = #tpu.pipeline_mode<synchronous>, transform_indices = @transform_3, window_bounds = array<i64: 256, 256>}, {pipeline_mode = #tpu.pipeline_mode<synchronous>, transform_indices = @transform_4, window_bounds = array<i64: 1, 256>}, {pipeline_mode = #tpu.pipeline_mode<synchronous>, transform_indices = @transform_5, window_bounds = array<i64: 256, 256>}, {pipeline_mode = #tpu.pipeline_mode<synchronous>, transform_indices = @transform_6, window_bounds = array<i64: 1, 256>}, {pipeline_mode = #tpu.pipeline_mode<synchronous>, transform_indices = @transform_7, window_bounds = array<i64: 256, 128>}, {pipeline_mode = #tpu.pipeline_mode<synchronous>, transform_indices = @transform_8, window_bounds = array<i64: 1, 128>}, {transform_indices = @transform_9, window_bounds = array<i64: 16, 128>}]} {
    %c0 = arith.constant 0 : index
    %c0_0 = arith.constant 0 : index
    %0 = vector.load %arg1[%c0, %c0_0] : memref<16x896xbf16, #tpu.memory_space<vmem>>, vector<16x896xbf16>
    %c0_1 = arith.constant 0 : index
    %c0_2 = arith.constant 0 : index
    %1 = vector.load %arg2[%c0_1, %c0_2] : memref<896x256xbf16, #tpu.memory_space<vmem>>, vector<896x256xbf16>
    %cst = arith.constant dense<0.000000e+00> : vector<16x256xf32>
    %2 = tpu.matmul %0, %1, %cst {dimension_numbers = #tpu.dot_dimension_numbers<[1], [0], [0], [1], [0, 0, 1, 1], [], []>} : vector<16x896xbf16>, vector<896x256xbf16>, vector<16x256xf32> -> vector<16x256xf32>
    %c0_3 = arith.constant 0 : index
    %c0_4 = arith.constant 0 : index
    %3 = vector.load %arg3[%c0_3, %c0_4] : memref<1x256xf32, #tpu.memory_space<vmem>>, vector<1x256xf32>
    %4 = vector.broadcast %3 : vector<1x256xf32> to vector<16x256xf32>
    %5 = arith.addf %2, %4 : vector<16x256xf32>
    %cst_5 = arith.constant 0.000000e+00 : f32
    %6 = vector.broadcast %cst_5 : f32 to vector<16x256xf32>
    %7 = arith.maximumf %5, %6 : vector<16x256xf32>
    %8 = arith.truncf %7 : vector<16x256xf32> to vector<16x256xbf16>
    %c0_6 = arith.constant 0 : index
    %c0_7 = arith.constant 0 : index
    %9 = vector.load %arg4[%c0_6, %c0_7] : memref<256x256xbf16, #tpu.memory_space<vmem>>, vector<256x256xbf16>
    %cst_8 = arith.constant dense<0.000000e+00> : vector<16x256xf32>
    %10 = tpu.matmul %8, %9, %cst_8 {dimension_numbers = #tpu.dot_dimension_numbers<[1], [0], [0], [1], [0, 0, 1, 1], [], []>} : vector<16x256xbf16>, vector<256x256xbf16>, vector<16x256xf32> -> vector<16x256xf32>
    %c0_9 = arith.constant 0 : index
    %c0_10 = arith.constant 0 : index
    %11 = vector.load %arg5[%c0_9, %c0_10] : memref<1x256xf32, #tpu.memory_space<vmem>>, vector<1x256xf32>
    %12 = vector.broadcast %11 : vector<1x256xf32> to vector<16x256xf32>
    %13 = arith.addf %10, %12 : vector<16x256xf32>
    %cst_11 = arith.constant 0.000000e+00 : f32
    %14 = vector.broadcast %cst_11 : f32 to vector<16x256xf32>
    %15 = arith.maximumf %13, %14 : vector<16x256xf32>
    %16 = arith.truncf %15 : vector<16x256xf32> to vector<16x256xbf16>
    %c0_12 = arith.constant 0 : index
    %c0_13 = arith.constant 0 : index
    %17 = vector.load %arg6[%c0_12, %c0_13] : memref<256x256xbf16, #tpu.memory_space<vmem>>, vector<256x256xbf16>
    %cst_14 = arith.constant dense<0.000000e+00> : vector<16x256xf32>
    %18 = tpu.matmul %16, %17, %cst_14 {dimension_numbers = #tpu.dot_dimension_numbers<[1], [0], [0], [1], [0, 0, 1, 1], [], []>} : vector<16x256xbf16>, vector<256x256xbf16>, vector<16x256xf32> -> vector<16x256xf32>
    %c0_15 = arith.constant 0 : index
    %c0_16 = arith.constant 0 : index
    %19 = vector.load %arg7[%c0_15, %c0_16] : memref<1x256xf32, #tpu.memory_space<vmem>>, vector<1x256xf32>
    %20 = vector.broadcast %19 : vector<1x256xf32> to vector<16x256xf32>
    %21 = arith.addf %18, %20 : vector<16x256xf32>
    %cst_17 = arith.constant 0.000000e+00 : f32
    %22 = vector.broadcast %cst_17 : f32 to vector<16x256xf32>
    %23 = arith.maximumf %21, %22 : vector<16x256xf32>
    %24 = arith.truncf %23 : vector<16x256xf32> to vector<16x256xbf16>
    %c0_18 = arith.constant 0 : index
    %c0_19 = arith.constant 0 : index
    %25 = vector.load %arg8[%c0_18, %c0_19] : memref<256x128xbf16, #tpu.memory_space<vmem>>, vector<256x128xbf16>
    %cst_20 = arith.constant dense<0.000000e+00> : vector<16x128xf32>
    %26 = tpu.matmul %24, %25, %cst_20 {dimension_numbers = #tpu.dot_dimension_numbers<[1], [0], [0], [1], [0, 0, 1, 1], [], []>} : vector<16x256xbf16>, vector<256x128xbf16>, vector<16x128xf32> -> vector<16x128xf32>
    %c0_21 = arith.constant 0 : index
    %c0_22 = arith.constant 0 : index
    %27 = vector.load %arg9[%c0_21, %c0_22] : memref<1x128xf32, #tpu.memory_space<vmem>>, vector<1x128xf32>
    %28 = vector.broadcast %27 : vector<1x128xf32> to vector<16x128xf32>
    %29 = arith.addf %26, %28 : vector<16x128xf32>
    %cst_23 = arith.constant dense<0xFF800000> : vector<16xf32>
    %30 = vector.multi_reduction <maximumf>, %29, %cst_23 [1] : vector<16x128xf32> to vector<16xf32>
    %31 = vector.shape_cast %30 : vector<16xf32> to vector<16x1xf32>
    %32 = vector.broadcast %31 : vector<16x1xf32> to vector<16x128xf32>
    %33 = arith.subf %29, %32 : vector<16x128xf32>
    %34 = math.exp %33 : vector<16x128xf32>
    %cst_24 = arith.constant dense<0.000000e+00> : vector<16xf32>
    %35 = vector.multi_reduction <add>, %34, %cst_24 [1] : vector<16x128xf32> to vector<16xf32>
    %36 = vector.shape_cast %35 : vector<16xf32> to vector<16x1xf32>
    %37 = math.log %36 : vector<16x1xf32>
    %38 = vector.broadcast %37 : vector<16x1xf32> to vector<16x128xf32>
    %39 = arith.subf %33, %38 : vector<16x128xf32>
    %c0_25 = arith.constant 0 : index
    %c0_26 = arith.constant 0 : index
    %40 = vector.load %arg10[%c0_25, %c0_26] : memref<16x128xf32, #tpu.memory_space<vmem>>, vector<16x128xf32>
    tpu.vector_store %arg10[%c0_25, %c0_26], %39 {strides = array<i32>} : memref<16x128xf32, #tpu.memory_space<vmem>>, vector<16x128xf32>,
    return
  }
  func.func @transform_0(%arg0: i32) -> (i32, i32) {
    %c0_i32 = arith.constant 0 : i32
    %c0_i32_0 = arith.constant 0 : i32
    return %arg0, %c0_i32 : i32, i32
  }
  func.func @transform_1(%arg0: i32) -> (i32, i32) {
    %c0_i32 = arith.constant 0 : i32
    %c0_i32_0 = arith.constant 0 : i32
    %c0_i32_1 = arith.constant 0 : i32
    return %c0_i32, %c0_i32_0 : i32, i32
  }
  func.func @transform_2(%arg0: i32) -> (i32, i32) {
    %c0_i32 = arith.constant 0 : i32
    %c0_i32_0 = arith.constant 0 : i32
    %c0_i32_1 = arith.constant 0 : i32
    return %c0_i32, %c0_i32_0 : i32, i32
  }
  func.func @transform_3(%arg0: i32) -> (i32, i32) {
    %c0_i32 = arith.constant 0 : i32
    %c0_i32_0 = arith.constant 0 : i32
    %c0_i32_1 = arith.constant 0 : i32
    return %c0_i32, %c0_i32_0 : i32, i32
  }
  func.func @transform_4(%arg0: i32) -> (i32, i32) {
    %c0_i32 = arith.constant 0 : i32
    %c0_i32_0 = arith.constant 0 : i32
    %c0_i32_1 = arith.constant 0 : i32
    return %c0_i32, %c0_i32_0 : i32, i32
  }
  func.func @transform_5(%arg0: i32) -> (i32, i32) {
    %c0_i32 = arith.constant 0 : i32
    %c0_i32_0 = arith.constant 0 : i32
    %c0_i32_1 = arith.constant 0 : i32
    return %c0_i32, %c0_i32_0 : i32, i32
  }
  func.func @transform_6(%arg0: i32) -> (i32, i32) {
    %c0_i32 = arith.constant 0 : i32
    %c0_i32_0 = arith.constant 0 : i32
    %c0_i32_1 = arith.constant 0 : i32
    return %c0_i32, %c0_i32_0 : i32, i32
  }
  func.func @transform_7(%arg0: i32) -> (i32, i32) {
    %c0_i32 = arith.constant 0 : i32
    %c0_i32_0 = arith.constant 0 : i32
    %c0_i32_1 = arith.constant 0 : i32
    return %c0_i32, %c0_i32_0 : i32, i32
  }
  func.func @transform_8(%arg0: i32) -> (i32, i32) {
    %c0_i32 = arith.constant 0 : i32
    %c0_i32_0 = arith.constant 0 : i32
    %c0_i32_1 = arith.constant 0 : i32
    return %c0_i32, %c0_i32_0 : i32, i32
  }
  func.func @transform_9(%arg0: i32) -> (i32, i32) {
    %c0_i32 = arith.constant 0 : i32
    %c0_i32_0 = arith.constant 0 : i32
    return %arg0, %c0_i32 : i32, i32
  }
}

</mosaic_0001>

<bundles_post_ra>
// kernel: tpu_custom_call.1
= control target key start
LH: loop header
LB: loop body
LE: loop exit
PB: predicated region body
PF: predicated region fallthrough
CT: control target
= control target key end

     0   :  { %14 = vsyncpa [#allocation3], 0  ;;  %s2507_s0 = inlined_call_operand.hbm [shape: bf16[16,896], index: 0, kind: input, shape index: {}]   ;;  %s2508_s1 = inlined_call_operand.hbm [shape: bf16[896,256], index: 1, kind: input, shape index: {}]   ;;  %s2509_s2 = inlined_call_operand.vmem [shape: f32[1,256], index: 2, kind: input, shape index: {}]   ;;  %s2510_s3 = inlined_call_operand.hbm [shape: bf16[256,256], index: 3, kind: input, shape index: {}]   ;;  %s2511_s4 = inlined_call_operand.vmem [shape: f32[1,256], index: 4, kind: input, shape index: {}]   ;;  %s2512_s5 = inlined_call_operand.hbm [shape: bf16[256,256], index: 5, kind: input, shape index: {}]   ;;  %s2513_s6 = inlined_call_operand.vmem [shape: f32[1,256], index: 6, kind: input, shape index: {}]   ;;  %s2514_s7 = inlined_call_operand.hbm [shape: bf16[256,128], index: 7, kind: input, shape index: {}]   ;;  %s2515_s8 = inlined_call_operand.vmem [shape: f32[1,128], index: 8, kind: input, shape index: {}]   ;;  %s2516_s9 = inlined_call_operand.hbm [shape: f32[16,128], index: 9, kind: output, shape index: {}]  }
   0x1   :  { %15 = vsyncpa [#allocation6], 0 }
   0x2   :  { %16 = vsyncpa [#allocation9], 0 }
   0x3   :  { %17 = vsyncpa [#allocation4], 0  ;;  %s2392_s30 = smov [#allocation5]  }
   0x4   :  { %s35_s10 = sshll.u32 %s2392_s30, 4  ;;  %s36_s10 = int_to_ptr.vmem [resolvable:$true] %s35_s10 }
   0x5   :  { %s2272_s11 = scalar_lea.vmem %s36_s10, 14336  ;;  %p2277_p1 = scmp.lt.s32.totalorder %s36_s10, %s36_s10 }
   0x6   :  { %p2273_p0 = scmp.ne.s32.totalorder %s36_s10, %s2272_s11  ;;  %p2278_p2 = scmp.lt.s32.totalorder %s2272_s11, %s2272_s11 }
   0x8   :  { %p2279_p3 = por %p2278_p2, %p2277_p1 }
   0xa   :  { %p2280_p4 = pnand %p2279_p3, %p2273_p0 }
   0xc   :  { %2283 = shalt.err (!%p2280_p4)
}
   0xd   :  { %s2393_s12 = smov 128   ;;  %s2394_s13 = smov 8  }
   0xe   :  { %41 = dma.hbm_to_vmem [thread:$0]  %s2508_s1, 14336, %s36_s10, [#allocation6], %s2393_s12, %s2393_s12, %s2394_s13  }
   0xf   :  { %s2395_s16 = smov [#allocation8]   ;;  %s2396_s18 = smov [#allocation2]  }
  0x10   :  { %s63_s17 = sshll.u32 %s2395_s16, 4  ;;  %s23_s19 = sshll.u32 %s2396_s18, 4  ;;  %s64_s17 = int_to_ptr.vmem [resolvable:$true] %s63_s17  ;;  %s24_s19 = int_to_ptr.vmem [resolvable:$true] %s23_s19 }
  0x11   :  { %s2292_s20 = scalar_lea.vmem %s64_s17, 4096  ;;  %p2297_p6 = scmp.lt.s32.totalorder %s64_s17, %s64_s17 }
  0x12   :  { %p2293_p5 = scmp.ne.s32.totalorder %s64_s17, %s2292_s20  ;;  %p2298_p7 = scmp.lt.s32.totalorder %s2292_s20, %s2292_s20 }
  0x14   :  { %p2299_p8 = por %p2298_p7, %p2297_p6 }
  0x16   :  { %p2300_p9 = pnand %p2299_p8, %p2293_p5 }
  0x18   :  { %2303 = shalt.err (!%p2300_p9)
}
  0x19   :  { %69 = dma.hbm_to_vmem [thread:$0]  %s2512_s5, 4096, %s64_s17, [#allocation9], %s2393_s12, %s2393_s12, %s2394_s13  }
  0x1a   :  { %s2312_s1 = scalar_lea.vmem %s24_s19, 896  ;;  %p2317_p11 = scmp.lt.s32.totalorder %s24_s19, %s24_s19 }
  0x1b   :  { %p2313_p10 = scmp.ne.s32.totalorder %s24_s19, %s2312_s1  ;;  %p2318_p12 = scmp.lt.s32.totalorder %s2312_s1, %s2312_s1 }
  0x1d   :  { %p2319_p13 = por %p2318_p12, %p2317_p11 }
  0x1f   :  { %p2320_p0 = pnand %p2319_p13, %p2313_p10 }
  0x21   :  { %2323 = shalt.err (!%p2320_p0)
}
  0x22   :  { %s2397_s23 = smov 448   ;;  %s2398_s24 = smov 28  }
  0x23   :  { %29 = dma.hbm_to_vmem [thread:$0]  %s2507_s0, 896, %s24_s19, [#allocation3], %s2397_s23, %s2397_s23, %s2398_s24  }
  0x24   :  { %s2399_s27 = smov [#allocation7]   ;;  %s2400_s29 = smov [#allocation10]  }
  0x25   :  { %s49_s28 = sshll.u32 %s2399_s27, 4  ;;  %s77_s30 = sshll.u32 %s2400_s29, 4  ;;  %s50_s28 = int_to_ptr.vmem [resolvable:$true] %s49_s28  ;;  %s78_s30 = int_to_ptr.vmem [resolvable:$true] %s77_s30 }
  0x26   :  { %s2332_s5 = scalar_lea.vmem %s50_s28, 4096  ;;  %p2337_p2 = scmp.lt.s32.totalorder %s50_s28, %s50_s28 }
  0x27   :  { %p2333_p1 = scmp.ne.s32.totalorder %s50_s28, %s2332_s5  ;;  %p2338_p3 = scmp.lt.s32.totalorder %s2332_s5, %s2332_s5 }
  0x29   :  { %p2339_p4 = por %p2338_p3, %p2337_p2 }
  0x2b   :  { %p2340_p5 = pnand %p2339_p4, %p2333_p1 }
  0x2d   :  { %2343 = shalt.err (!%p2340_p5)
}
  0x2e   :  { %55 = dma.hbm_to_vmem [thread:$0]  %s2510_s3, 4096, %s50_s28, [#allocation6], %s2393_s12, %s2393_s12, %s2394_s13  }
  0x2f   :  { %s2352_s0 = scalar_lea.vmem %s78_s30, 2048  ;;  %p2357_p7 = scmp.lt.s32.totalorder %s78_s30, %s78_s30 }
  0x30   :  { %p2353_p6 = scmp.ne.s32.totalorder %s78_s30, %s2352_s0  ;;  %p2358_p8 = scmp.lt.s32.totalorder %s2352_s0, %s2352_s0 }
  0x32   :  { %p2359_p9 = por %p2358_p8, %p2357_p7 }
  0x34   :  { %p2360_p10 = pnand %p2359_p9, %p2353_p6 }
  0x36   :  { %2363 = shalt.err (!%p2360_p10)
}
  0x37   :  { %s2401_s14 = smov 64   ;;  %s2402_s15 = smov 4  }
  0x38   :  { %83 = dma.hbm_to_vmem [thread:$0]  %s2514_s7, 2048, %s78_s30, [#allocation9], %s2401_s14, %s2401_s14, %s2402_s15  }
  0x39   :  { %2384 = dma.done.wait [#allocation3], 896  }
  0x3a   :  { %2385 = vsyncadd [#allocation3], 4294966400 }
  0x3b   :  { %2386 = dma.done.wait [#allocation6], 18432  }
  0x3c   :  { %2387 = vsyncadd [#allocation6], 4294948864 }
  0x3d   :  { %2388 = dma.done.wait [#allocation9], 6144  }
  0x3e   :  { %2389 = vsyncadd [#allocation9], 4294961152  ;;  %v1966_v0 = vld [vmem:[#allocation5 + $0x74] ss:$8 sps:$4 sm:$0xff]   ;;  %v1968_v1 = vld [vmem:[#allocation5 + $0x70] ss:$8 sps:$4 sm:$0xff]  }
  0x3f   :  { %830 = vmatprep.subr.bf16.mxu0 %v1966_v0  ;;  %v1969_v2 = vld [vmem:[#allocation5 + $0x174] ss:$8 sps:$4 sm:$0xff]   ;;  %v1971_v3 = vld [vmem:[#allocation5 + $0x170] ss:$8 sps:$4 sm:$0xff]   ;;  %v1972_v4 = vld [vmem:[#allocation5 + $0x64] ss:$8 sps:$4 sm:$0xff]  }
  0x40   :  { %831 = vmatpush1.bf16.msra.mxu0 %v1968_v1  ;;  %v1974_v5 = vld [vmem:[#allocation5 + $0x60] ss:$8 sps:$4 sm:$0xff]   ;;  %873 = vmatprep.subr.bf16.mxu1 %v1969_v2  ;;  %v1975_v6 = vld [vmem:[#allocation5 + $0x164] ss:$8 sps:$4 sm:$0xff]   ;;  %v1978_v8 = vld [vmem:[#allocation5 + $0x54] ss:$8 sps:$4 sm:$0xff]  }
  0x41   :  { %874 = vmatpush1.bf16.msra.mxu1 %v1971_v3  ;;  %832 = vmatprep.subr.bf16.mxu0 %v1972_v4  ;;  %v1977_v7 = vld [vmem:[#allocation5 + $0x160] ss:$8 sps:$4 sm:$0xff]   ;;  %v1980_v9 = vld [vmem:[#allocation5 + $0x50] ss:$8 sps:$4 sm:$0xff]   ;;  %v1981_v10 = vld [vmem:[#allocation5 + $0x154] ss:$8 sps:$4 sm:$0xff]  }
  0x42   :  { %875 = vmatprep.subr.bf16.mxu1 %v1975_v6  ;;  %v1984_v11 = vld [vmem:[#allocation5 + $0x44] ss:$8 sps:$4 sm:$0xff]   ;;  %v1983_v12 = vld [vmem:[#allocation5 + $0x150] ss:$8 sps:$4 sm:$0xff]   ;;  %v1986_v14 = vld [vmem:[#allocation5 + $0x40] ss:$8 sps:$4 sm:$0xff]  }
  0x43   :  { %v1987_v13 = vld [vmem:[#allocation5 + $0x144] ss:$8 sps:$4 sm:$0xff]   ;;  %v1990_v15 = vld [vmem:[#allocation5 + $0x34] ss:$8 sps:$4 sm:$0xff]   ;;  %v1989_v16 = vld [vmem:[#allocation5 + $0x140] ss:$8 sps:$4 sm:$0xff]  }
  0x44   :  { %833 = vmatpush1.bf16.msra.mxu0 %v1974_v5  ;;  %v1993_v17 = vld [vmem:[#allocation5 + $0x134] ss:$8 sps:$4 sm:$0xff]   ;;  %v1992_v18 = vld [vmem:[#allocation5 + $0x30] ss:$8 sps:$4 sm:$0xff]   ;;  %v1996_v19 = vld [vmem:[#allocation5 + $0x24] ss:$8 sps:$4 sm:$0xff]  }
  0x45   :  { %834 = vmatprep.subr.bf16.mxu0 %v1978_v8  ;;  %876 = vmatpush1.bf16.msra.mxu1 %v1977_v7  ;;  %v1995_v20 = vld [vmem:[#allocation5 + $0x130] ss:$8 sps:$4 sm:$0xff]   ;;  %v1999_v21 = vld [vmem:[#allocation5 + $0x124] ss:$8 sps:$4 sm:$0xff]   ;;  %v1998_v22 = vld [vmem:[#allocation5 + $0x20] ss:$8 sps:$4 sm:$0xff]  }
  0x46   :  { %877 = vmatprep.subr.bf16.mxu1 %v1981_v10  ;;  %v2002_v23 = vld [vmem:[#allocation5 + $0x14] ss:$8 sps:$4 sm:$0xff]   ;;  %v2001_v24 = vld [vmem:[#allocation5 + $0x120] ss:$8 sps:$4 sm:$0xff]   ;;  %v2004_v26 = vld [vmem:[#allocation5 + $0x10] ss:$8 sps:$4 sm:$0xff]  }
  0x47   :  { %v2005_v25 = vld [vmem:[#allocation5 + $0x114] ss:$8 sps:$4 sm:$0xff]   ;;  %v2008_v27 = vld [vmem:[#allocation5 + $0x4] ss:$8 sps:$4 sm:$0xff]   ;;  %v2007_v28 = vld [vmem:[#allocation5 + $0x110] ss:$8 sps:$4 sm:$0xff]  }
  0x48   :  { %835 = vmatpush1.bf16.msra.mxu0 %v1980_v9  ;;  %v2011_v29 = vld [vmem:[#allocation5 + $0x104] ss:$8 sps:$4 sm:$0xff]   ;;  %v2010_v30 = vld [vmem:[#allocation5] ss:$8 sps:$4 sm:$0xff]   ;;  %v2014_v31 = vld [vmem:[#allocation5 + $0xf4] ss:$8 sps:$4 sm:$0xff]  }
  0x49   :  { %836 = vmatprep.subr.bf16.mxu0 %v1984_v11  ;;  %878 = vmatpush1.bf16.msra.mxu1 %v1983_v12  ;;  %v2013_v32 = vld [vmem:[#allocation5 + $0x100] ss:$8 sps:$4 sm:$0xff]   ;;  %v2017_v33 = vld [vmem:[#allocation5 + $0x1f4] ss:$8 sps:$4 sm:$0xff]   ;;  %v2016_v34 = vld [vmem:[#allocation5 + $0xf0] ss:$8 sps:$4 sm:$0xff]  }
  0x4a   :  { %879 = vmatprep.subr.bf16.mxu1 %v1987_v13  ;;  %v2020_v35 = vld [vmem:[#allocation5 + $0xe4] ss:$8 sps:$4 sm:$0xff]   ;;  %v2019_v36 = vld [vmem:[#allocation5 + $0x1f0] ss:$8 sps:$4 sm:$0xff]   ;;  %v2022_v38 = vld [vmem:[#allocation5 + $0xe0] ss:$8 sps:$4 sm:$0xff]  }
  0x4b   :  { %v2023_v37 = vld [vmem:[#allocation5 + $0x1e4] ss:$8 sps:$4 sm:$0xff]   ;;  %v2026_v39 = vld [vmem:[#allocation5 + $0xd4] ss:$8 sps:$4 sm:$0xff]   ;;  %v2025_v40 = vld [vmem:[#allocation5 + $0x1e0] ss:$8 sps:$4 sm:$0xff]  }
  0x4c   :  { %837 = vmatpush1.bf16.msra.mxu0 %v1986_v14  ;;  %v2029_v41 = vld [vmem:[#allocation5 + $0x1d4] ss:$8 sps:$4 sm:$0xff]   ;;  %v2028_v42 = vld [vmem:[#allocation5 + $0xd0] ss:$8 sps:$4 sm:$0xff]   ;;  %v2032_v43 = vld [vmem:[#allocation5 + $0xc4] ss:$8 sps:$4 sm:$0xff]  }
  0x4d   :  { %838 = vmatprep.subr.bf16.mxu0 %v1990_v15  ;;  %880 = vmatpush1.bf16.msra.mxu1 %v1989_v16  ;;  %v2031_v44 = vld [vmem:[#allocation5 + $0x1d0] ss:$8 sps:$4 sm:$0xff]   ;;  %v2035_v45 = vld [vmem:[#allocation5 + $0x1c4] ss:$8 sps:$4 sm:$0xff]   ;;  %v2034_v46 = vld [vmem:[#allocation5 + $0xc0] ss:$8 sps:$4 sm:$0xff]  }
  0x4e   :  { %881 = vmatprep.subr.bf16.mxu1 %v1993_v17  ;;  %v2063_v47 = vld [vmem:[#allocation2 + $0x4] ss:$28 sps:$4 sm:$0xff]   ;;  %v2038_v48 = vld [vmem:[#allocation5 + $0xb4] ss:$8 sps:$4 sm:$0xff]   ;;  %v2040_v52 = vld [vmem:[#allocation5 + $0xb0] ss:$8 sps:$4 sm:$0xff]  }
  0x4f   :  { %v2037_v49 = vld [vmem:[#allocation5 + $0x1c0] ss:$8 sps:$4 sm:$0xff]   ;;  %862 = vmatprep.mubr.bf16.mxu0 %v2063_v47  ;;  %v2041_v50 = vld [vmem:[#allocation5 + $0x1b4] ss:$8 sps:$4 sm:$0xff]   ;;  %v2044_v53 = vld [vmem:[#allocation5 + $0xa4] ss:$8 sps:$4 sm:$0xff]  }
  0x50   :  { %839 = vmatpush1.bf16.msra.mxu0 %v1992_v18  ;;  %v2070_v51 = vld [vmem:[#allocation2 + $0xc] ss:$28 sps:$4 sm:$0xff]   ;;  %v2047_v55 = vld [vmem:[#allocation5 + $0x1a4] ss:$8 sps:$4 sm:$0xff]   ;;  %v2046_v56 = vld [vmem:[#allocation5 + $0xa0] ss:$8 sps:$4 sm:$0xff]  }
  0x51   :  { %840 = vmatprep.subr.bf16.mxu0 %v1996_v19  ;;  %882 = vmatpush1.bf16.msra.mxu1 %v1995_v20  ;;  %v2043_v54 = vld [vmem:[#allocation5 + $0x1b0] ss:$8 sps:$4 sm:$0xff]   ;;  %v2050_v57 = vld [vmem:[#allocation5 + $0x94] ss:$8 sps:$4 sm:$0xff]   ;;  %v2049_v58 = vld [vmem:[#allocation5 + $0x1a0] ss:$8 sps:$4 sm:$0xff]  }
  0x52   :  { %883 = vmatprep.subr.bf16.mxu1 %v1999_v21  ;;  %905 = vmatprep.mubr.bf16.mxu1 %v2070_v51  ;;  %v2053_v59 = vld [vmem:[#allocation5 + $0x194] ss:$8 sps:$4 sm:$0xff]   ;;  %v2052_v60 = vld [vmem:[#allocation5 + $0x90] ss:$8 sps:$4 sm:$0xff]   ;;  %v2056_v61 = vld [vmem:[#allocation5 + $0x84] ss:$8 sps:$4 sm:$0xff]  }
  0x53   :  { %v2055_v62 = vld [vmem:[#allocation5 + $0x190] ss:$8 sps:$4 sm:$0xff]   ;;  %v2059_v63 = vld [vmem:[#allocation5 + $0x184] ss:$8 sps:$4 sm:$0xff]   ;;  %v2058_v0 = vld [vmem:[#allocation5 + $0x80] ss:$8 sps:$4 sm:$0xff]  }
  0x54   :  { %841 = vmatpush1.bf16.msra.mxu0 %v1998_v22  ;;  %v2067_v1 = vld [vmem:[#allocation5 + $0x274] ss:$8 sps:$4 sm:$0xff]   ;;  %v2064_v2 = vld [vmem:[#allocation5 + $0x180] ss:$8 sps:$4 sm:$0xff]   ;;  %v2065_v5 = vld [vmem:[#allocation5 + $0x270] ss:$8 sps:$4 sm:$0xff]  }
  0x55   :  { %842 = vmatprep.subr.bf16.mxu0 %v2002_v23  ;;  %884 = vmatpush1.bf16.msra.mxu1 %v2001_v24  ;;  %v2061_v3 = vld [vmem:[#allocation2] ss:$28 sps:$4 sm:$0xff]   ;;  %v2094_v4 = vld [vmem:[#allocation5 + $0x374] ss:$8 sps:$4 sm:$0xff]   ;;  %v2068_v6 = vld [vmem:[#allocation2 + $0x8] ss:$28 sps:$4 sm:$0xff]  }
  0x56   :  { %885 = vmatprep.subr.bf16.mxu1 %v2005_v25  ;;  %v2073_v7 = vld [vmem:[#allocation5 + $0x264] ss:$8 sps:$4 sm:$0xff]   ;;  %v2092_v8 = vld [vmem:[#allocation5 + $0x370] ss:$8 sps:$4 sm:$0xff]   ;;  %v2071_v10 = vld [vmem:[#allocation5 + $0x260] ss:$8 sps:$4 sm:$0xff]  }
  0x57   :  { %v2100_v9 = vld [vmem:[#allocation5 + $0x364] ss:$8 sps:$4 sm:$0xff]   ;;  %v2076_v11 = vld [vmem:[#allocation5 + $0x254] ss:$8 sps:$4 sm:$0xff]   ;;  %v2098_v12 = vld [vmem:[#allocation5 + $0x360] ss:$8 sps:$4 sm:$0xff]  }
  0x58   :  { %843 = vmatpush1.bf16.msra.mxu0 %v2004_v26  ;;  %v2403_v13 = vmov 0   ;;  %v2106_v14 = vld [vmem:[#allocation5 + $0x354] ss:$8 sps:$4 sm:$0xff]   ;;  %v2074_v15 = vld [vmem:[#allocation5 + $0x250] ss:$8 sps:$4 sm:$0xff]  }
  0x59   :  { %844 = vmatprep.subr.bf16.mxu0 %v2008_v27  ;;  %886 = vmatpush1.bf16.msra.mxu1 %v2007_v28  ;;  %v2079_v16 = vld [vmem:[#allocation5 + $0x244] ss:$8 sps:$4 sm:$0xff]   ;;  %v2104_v17 = vld [vmem:[#allocation5 + $0x350] ss:$8 sps:$4 sm:$0xff]   ;;  %v2077_v19 = vld [vmem:[#allocation5 + $0x240] ss:$8 sps:$4 sm:$0xff]  }
  0x5a   :  { %887 = vmatprep.subr.bf16.mxu1 %v2011_v29  ;;  %v2112_v18 = vld [vmem:[#allocation5 + $0x344] ss:$8 sps:$4 sm:$0xff]   ;;  %v2082_v20 = vld [vmem:[#allocation5 + $0x234] ss:$8 sps:$4 sm:$0xff]   ;;  %v2080_v21 = vld [vmem:[#allocation5 + $0x230] ss:$8 sps:$4 sm:$0xff]  }
  0x5b   :  { %v2110_v22 = vld [vmem:[#allocation5 + $0x340] ss:$8 sps:$4 sm:$0xff]   ;;  %v2118_v23 = vld [vmem:[#allocation5 + $0x334] ss:$8 sps:$4 sm:$0xff]   ;;  %v2085_v24 = vld [vmem:[#allocation5 + $0x224] ss:$8 sps:$4 sm:$0xff]  }
  0x5c   :  { %845 = vmatpush1.bf16.msra.mxu0 %v2010_v30  ;;  %v2116_v25 = vld [vmem:[#allocation5 + $0x330] ss:$8 sps:$4 sm:$0xff]   ;;  %v2124_v27 = vld [vmem:[#allocation5 + $0x324] ss:$8 sps:$4 sm:$0xff]   ;;  %v2083_v28 = vld [vmem:[#allocation5 + $0x220] ss:$8 sps:$4 sm:$0xff]  }
  0x5d   :  { %846 = vmatprep.subr.bf16.mxu0 %v2014_v31  ;;  %888 = vmatpush1.bf16.msra.mxu1 %v2013_v32  ;;  %v2143_v26 = vld [vmem:[#allocation2 + $0x14] ss:$28 sps:$4 sm:$0xff]   ;;  %v2122_v30 = vld [vmem:[#allocation5 + $0x320] ss:$8 sps:$4 sm:$0xff]  }
  0x5e   :  { %889 = vmatprep.subr.bf16.mxu1 %v2017_v33  ;;  %v2088_v29 = vld [vmem:[#allocation5 + $0x214] ss:$8 sps:$4 sm:$0xff]   ;;  %v2086_v32 = vld [vmem:[#allocation5 + $0x210] ss:$8 sps:$4 sm:$0xff]   ;;  %v2091_v33 = vld [vmem:[#allocation5 + $0x204] ss:$8 sps:$4 sm:$0xff]  }
  0x5f   :  { %v2130_v31 = vld [vmem:[#allocation5 + $0x314] ss:$8 sps:$4 sm:$0xff]  }
  0x60   :  { %847 = vmatpush2.bf16.msra.mxu0 %v2016_v34  ;;  %v2128_v34 = vld [vmem:[#allocation5 + $0x310] ss:$8 sps:$4 sm:$0xff]   ;;  %v2121_v47 = vld [vmem:[#allocation5 + $0x2b4] ss:$8 sps:$4 sm:$0xff]  }
  0x61   :  { %848 = vmatprep.subr.bf16.mxu0 %v2020_v35  ;;  %890 = vmatpush2.bf16.msra.mxu1 %v2019_v36  ;;  %v2136_v35 = vld [vmem:[#allocation5 + $0x304] ss:$8 sps:$4 sm:$0xff]   ;;  %v2089_v36 = vld [vmem:[#allocation5 + $0x200] ss:$8 sps:$4 sm:$0xff]   ;;  %v2133_v51 = vld [vmem:[#allocation5 + $0x294] ss:$8 sps:$4 sm:$0xff]  }
  0x62   :  { %891 = vmatprep.subr.bf16.mxu1 %v2023_v37  ;;  %v2097_v37 = vld [vmem:[#allocation5 + $0x2f4] ss:$8 sps:$4 sm:$0xff]  }
  0x64   :  { %849 = vmatpush2.bf16.msra.mxu0 %v2022_v38  ;;  %v2134_v38 = vld [vmem:[#allocation5 + $0x300] ss:$8 sps:$4 sm:$0xff]  }
  0x65   :  { %850 = vmatprep.subr.bf16.mxu0 %v2026_v39  ;;  %892 = vmatpush2.bf16.msra.mxu1 %v2025_v40  ;;  %v2095_v39 = vld [vmem:[#allocation5 + $0x2f0] ss:$8 sps:$4 sm:$0xff]   ;;  %v2103_v40 = vld [vmem:[#allocation5 + $0x2e4] ss:$8 sps:$4 sm:$0xff]  }
  0x66   :  { %893 = vmatprep.subr.bf16.mxu1 %v2029_v41  ;;  %v2140_v41 = vld [vmem:[#allocation2 + $0x18] ss:$28 sps:$4 sm:$0xff]  }
  0x68   :  { %851 = vmatpush2.bf16.msra.mxu0 %v2028_v42  ;;  %v2101_v42 = vld [vmem:[#allocation5 + $0x2e0] ss:$8 sps:$4 sm:$0xff]  }
  0x69   :  { %852 = vmatprep.subr.bf16.mxu0 %v2032_v43  ;;  %894 = vmatpush2.bf16.msra.mxu1 %v2031_v44  ;;  %v2109_v43 = vld [vmem:[#allocation5 + $0x2d4] ss:$8 sps:$4 sm:$0xff]   ;;  %v2107_v44 = vld [vmem:[#allocation5 + $0x2d0] ss:$8 sps:$4 sm:$0xff]  }
  0x6a   :  { %895 = vmatprep.subr.bf16.mxu1 %v2035_v45  ;;  %v2115_v45 = vld [vmem:[#allocation5 + $0x2c4] ss:$8 sps:$4 sm:$0xff]  }
  0x6c   :  { %853 = vmatpush2.bf16.msra.mxu0 %v2034_v46  ;;  %v2113_v46 = vld [vmem:[#allocation5 + $0x2c0] ss:$8 sps:$4 sm:$0xff]  }
  0x6d   :  { %854 = vmatprep.subr.bf16.mxu0 %v2038_v48  ;;  %896 = vmatpush2.bf16.msra.mxu1 %v2037_v49  ;;  %v2119_v48 = vld [vmem:[#allocation5 + $0x2b0] ss:$8 sps:$4 sm:$0xff]   ;;  %v2127_v49 = vld [vmem:[#allocation5 + $0x2a4] ss:$8 sps:$4 sm:$0xff]  }
  0x6e   :  { %897 = vmatprep.subr.bf16.mxu1 %v2041_v50  ;;  %v2125_v50 = vld [vmem:[#allocation5 + $0x2a0] ss:$8 sps:$4 sm:$0xff]  }
  0x70   :  { %855 = vmatpush2.bf16.msra.mxu0 %v2040_v52  ;;  %v2131_v52 = vld [vmem:[#allocation5 + $0x290] ss:$8 sps:$4 sm:$0xff]  }
  0x71   :  { %856 = vmatprep.subr.bf16.mxu0 %v2044_v53  ;;  %898 = vmatpush2.bf16.msra.mxu1 %v2043_v54  ;;  %v2139_v53 = vld [vmem:[#allocation5 + $0x284] ss:$8 sps:$4 sm:$0xff]   ;;  %v2137_v54 = vld [vmem:[#allocation5 + $0x280] ss:$8 sps:$4 sm:$0xff]  }
  0x72   :  { %899 = vmatprep.subr.bf16.mxu1 %v2047_v55  ;;  %v2141_v55 = vld [vmem:[#allocation2 + $0x10] ss:$28 sps:$4 sm:$0xff]  }
  0x74   :  { %857 = vmatpush2.bf16.msra.mxu0 %v2046_v56  ;;  %v2144_v56 = vld [vmem:[#allocation7 + $0x70] ss:$8 sps:$4 sm:$0xff]  }
  0x75   :  { %858 = vmatprep.subr.bf16.mxu0 %v2050_v57  ;;  %900 = vmatpush2.bf16.msra.mxu1 %v2049_v58  ;;  %v2146_v57 = vld [vmem:[#allocation7 + $0x74] ss:$8 sps:$4 sm:$0xff]   ;;  %v2149_v58 = vld [vmem:[#allocation7 + $0x64] ss:$8 sps:$4 sm:$0xff]  }
  0x76   :  { %901 = vmatprep.subr.bf16.mxu1 %v2053_v59  ;;  %v2147_v59 = vld [vmem:[#allocation7 + $0x60] ss:$8 sps:$4 sm:$0xff]  }
  0x78   :  { %859 = vmatpush2.bf16.msra.mxu0 %v2052_v60  ;;  %v2152_v60 = vld [vmem:[#allocation7 + $0x54] ss:$8 sps:$4 sm:$0xff]  }
  0x79   :  { %860 = vmatprep.subr.bf16.mxu0 %v2056_v61  ;;  %902 = vmatpush2.bf16.msra.mxu1 %v2055_v62  ;;  %v2150_v61 = vld [vmem:[#allocation7 + $0x50] ss:$8 sps:$4 sm:$0xff]   ;;  %v2155_v62 = vld [vmem:[#allocation7 + $0x44] ss:$8 sps:$4 sm:$0xff]  }
  0x7a   :  { %903 = vmatprep.subr.bf16.mxu1 %v2059_v63  ;;  %v2153_v63 = vld [vmem:[#allocation7 + $0x40] ss:$8 sps:$4 sm:$0xff]  }
  0x7c   :  { %861 = vmatpush2.bf16.msra.mxu0 %v2058_v0  ;;  %v2158_v0 = vld [vmem:[#allocation7 + $0x34] ss:$8 sps:$4 sm:$0xff]  }
  0x7d   :  { %916 = vmatprep.subr.bf16.mxu0 %v2067_v1  ;;  %904 = vmatpush2.bf16.msra.mxu1 %v2064_v2  ;;  %v2156_v1 = vld [vmem:[#allocation7 + $0x30] ss:$8 sps:$4 sm:$0xff]   ;;  %v2161_v2 = vld [vmem:[#allocation7 + $0x24] ss:$8 sps:$4 sm:$0xff]  }
  0x7e   :  { %959 = vmatprep.subr.bf16.mxu1 %v2094_v4  ;;  %v2164_v4 = vld [vmem:[#allocation7 + $0x14] ss:$8 sps:$4 sm:$0xff]  }
  0x7f   :  { %863 = vmatmul.mubr.bf16.vlgmr.msra.gmra.mxu0 %v2061_v3  ;;  %v2159_v3 = vld [vmem:[#allocation7 + $0x20] ss:$8 sps:$4 sm:$0xff]  }
  0x80   :  { %917 = vmatpush1.bf16.msra.mxu0 %v2065_v5  ;;  %906 = vmatmul.mubr.bf16.vlgmr.msra.gmra.mxu1 %v2068_v6  ;;  %v2162_v5 = vld [vmem:[#allocation7 + $0x10] ss:$8 sps:$4 sm:$0xff]   ;;  %v2167_v6 = vld [vmem:[#allocation7 + $0x4] ss:$8 sps:$4 sm:$0xff]  }
  0x81   :  { %918 = vmatprep.subr.bf16.mxu0 %v2073_v7  ;;  %960 = vmatpush1.bf16.msra.mxu1 %v2092_v8  ;;  %v2165_v7 = vld [vmem:[#allocation7] ss:$8 sps:$4 sm:$0xff]   ;;  %v2170_v8 = vld [vmem:[#allocation7 + $0xf4] ss:$8 sps:$4 sm:$0xff]  }
  0x82   :  { %991 = vmatprep.mubr.bf16.mxu1 %v2403_v13  ;;  %961 = vmatprep.subr.bf16.mxu1 %v2100_v9  ;;  %v2168_v9 = vld [vmem:[#allocation7 + $0xf0] ss:$8 sps:$4 sm:$0xff]  }
  0x83   :  { %948 = vmatprep.mubr.bf16.mxu0 %v2143_v26  ;;  %v2174_v13 = vld [vmem:[#allocation7 + $0xd0] ss:$8 sps:$4 sm:$0xff]   ;;  %v2197_v26 = vld [vmem:[#allocation8 + $0x64] ss:$8 sps:$4 sm:$0xff]  }
  0x84   :  { %919 = vmatpush1.bf16.msra.mxu0 %v2071_v10  ;;  %v2173_v10 = vld [vmem:[#allocation7 + $0xe4] ss:$8 sps:$4 sm:$0xff]  }
  0x85   :  { %920 = vmatprep.subr.bf16.mxu0 %v2076_v11  ;;  %962 = vmatpush1.bf16.msra.mxu1 %v2098_v12  ;;  %v2171_v11 = vld [vmem:[#allocation7 + $0xe0] ss:$8 sps:$4 sm:$0xff]   ;;  %v2176_v12 = vld [vmem:[#allocation7 + $0xd4] ss:$8 sps:$4 sm:$0xff]  }
  0x86   :  { %963 = vmatprep.subr.bf16.mxu1 %v2106_v14  ;;  %v2179_v14 = vld [vmem:[#allocation7 + $0xc4] ss:$8 sps:$4 sm:$0xff]  }
  0x88   :  { %921 = vmatpush1.bf16.msra.mxu0 %v2074_v15  ;;  %v2177_v15 = vld [vmem:[#allocation7 + $0xc0] ss:$8 sps:$4 sm:$0xff]  }
  0x89   :  { %922 = vmatprep.subr.bf16.mxu0 %v2079_v16  ;;  %964 = vmatpush1.bf16.msra.mxu1 %v2104_v17  ;;  %v2182_v16 = vld [vmem:[#allocation7 + $0xb4] ss:$8 sps:$4 sm:$0xff]   ;;  %v2180_v17 = vld [vmem:[#allocation7 + $0xb0] ss:$8 sps:$4 sm:$0xff]  }
  0x8a   :  { %965 = vmatprep.subr.bf16.mxu1 %v2112_v18  ;;  %v2185_v18 = vld [vmem:[#allocation7 + $0xa4] ss:$8 sps:$4 sm:$0xff]  }
  0x8c   :  { %923 = vmatpush1.bf16.msra.mxu0 %v2077_v19  ;;  %v2183_v19 = vld [vmem:[#allocation7 + $0xa0] ss:$8 sps:$4 sm:$0xff]  }
  0x8d   :  { %924 = vmatprep.subr.bf16.mxu0 %v2082_v20  ;;  %966 = vmatpush1.bf16.msra.mxu1 %v2110_v22  ;;  %v2188_v20 = vld [vmem:[#allocation7 + $0x94] ss:$8 sps:$4 sm:$0xff]   ;;  %v2191_v22 = vld [vmem:[#allocation7 + $0x84] ss:$8 sps:$4 sm:$0xff]  }
  0x8e   :  { %967 = vmatprep.subr.bf16.mxu1 %v2118_v23  ;;  %v2189_v23 = vld [vmem:[#allocation7 + $0x80] ss:$8 sps:$4 sm:$0xff]  }
  0x90   :  { %925 = vmatpush1.bf16.msra.mxu0 %v2080_v21  ;;  %v2186_v21 = vld [vmem:[#allocation7 + $0x90] ss:$8 sps:$4 sm:$0xff]  }
  0x91   :  { %926 = vmatprep.subr.bf16.mxu0 %v2085_v24  ;;  %968 = vmatpush1.bf16.msra.mxu1 %v2116_v25  ;;  %v2192_v24 = vld [vmem:[#allocation8 + $0x70] ss:$8 sps:$4 sm:$0xff]   ;;  %v2194_v25 = vld [vmem:[#allocation8 + $0x74] ss:$8 sps:$4 sm:$0xff]  }
  0x92   :  { %969 = vmatprep.subr.bf16.mxu1 %v2124_v27  ;;  %v2195_v27 = vld [vmem:[#allocation8 + $0x60] ss:$8 sps:$4 sm:$0xff]  }
  0x94   :  { %927 = vmatpush1.bf16.msra.mxu0 %v2083_v28  ;;  %v2200_v28 = vld [vmem:[#allocation8 + $0x54] ss:$8 sps:$4 sm:$0xff]  }
  0x95   :  { %928 = vmatprep.subr.bf16.mxu0 %v2088_v29  ;;  %970 = vmatpush1.bf16.msra.mxu1 %v2122_v30  ;;  %v2198_v29 = vld [vmem:[#allocation8 + $0x50] ss:$8 sps:$4 sm:$0xff]   ;;  %v2203_v30 = vld [vmem:[#allocation8 + $0x44] ss:$8 sps:$4 sm:$0xff]  }
  0x96   :  { %971 = vmatprep.subr.bf16.mxu1 %v2130_v31  ;;  %v2201_v31 = vld [vmem:[#allocation8 + $0x40] ss:$8 sps:$4 sm:$0xff]  }
  0x98   :  { %929 = vmatpush1.bf16.msra.mxu0 %v2086_v32  ;;  %v2206_v32 = vld [vmem:[#allocation8 + $0x34] ss:$8 sps:$4 sm:$0xff]  }
  0x99   :  { %930 = vmatprep.subr.bf16.mxu0 %v2091_v33  ;;  %972 = vmatpush1.bf16.msra.mxu1 %v2128_v34  ;;  %v2204_v33 = vld [vmem:[#allocation8 + $0x30] ss:$8 sps:$4 sm:$0xff]   ;;  %v2209_v34 = vld [vmem:[#allocation8 + $0x24] ss:$8 sps:$4 sm:$0xff]  }
  0x9a   :  { %973 = vmatprep.subr.bf16.mxu1 %v2136_v35  ;;  %v2207_v35 = vld [vmem:[#allocation8 + $0x20] ss:$8 sps:$4 sm:$0xff]  }
  0x9c   :  { %931 = vmatpush1.bf16.msra.mxu0 %v2089_v36  ;;  %v2212_v36 = vld [vmem:[#allocation8 + $0x14] ss:$8 sps:$4 sm:$0xff]  }
  0x9d   :  { %932 = vmatprep.subr.bf16.mxu0 %v2097_v37  ;;  %974 = vmatpush1.bf16.msra.mxu1 %v2134_v38  ;;  %v2210_v37 = vld [vmem:[#allocation8 + $0x10] ss:$8 sps:$4 sm:$0xff]   ;;  %v2215_v38 = vld [vmem:[#allocation8 + $0x4] ss:$8 sps:$4 sm:$0xff]  }
  0x9e   :  { %1212 = vmatprep.subr.bf16.mxu1 %v2146_v57 }
  0xa0   :  { %933 = vmatpush2.bf16.msra.mxu0 %v2095_v39  ;;  %992 = vmatmul.mubr.bf16.vlgmr.msra.gmra.mxu1 %v2140_v41  ;;  %v2213_v39 = vld [vmem:[#allocation8] ss:$8 sps:$4 sm:$0xff]   ;;  %v2216_v41 = vld [vmem:[#allocation8 + $0xf0] ss:$8 sps:$4 sm:$0xff]  }
  0xa1   :  { %934 = vmatprep.subr.bf16.mxu0 %v2103_v40  ;;  %1213 = vmatpush1.bf16.msra.mxu1 %v2144_v56  ;;  %v2218_v40 = vld [vmem:[#allocation8 + $0xf4] ss:$8 sps:$4 sm:$0xff]   ;;  %v222_v56 = vld [vmem:[%s2509_s2] sm:$0x3] }
  0xa2   :  { %1214 = vmatprep.subr.bf16.mxu1 %v2149_v58 }
  0xa4   :  { %935 = vmatpush2.bf16.msra.mxu0 %v2101_v42  ;;  %v2221_v42 = vld [vmem:[#allocation8 + $0xe4] ss:$8 sps:$4 sm:$0xff]  }
  0xa5   :  { %936 = vmatprep.subr.bf16.mxu0 %v2109_v43  ;;  %1215 = vmatpush1.bf16.msra.mxu1 %v2147_v59  ;;  %v2219_v43 = vld [vmem:[#allocation8 + $0xe0] ss:$8 sps:$4 sm:$0xff]  }
  0xa6   :  { %1216 = vmatprep.subr.bf16.mxu1 %v2152_v60 }
  0xa8   :  { %937 = vmatpush2.bf16.msra.mxu0 %v2107_v44  ;;  %v2224_v44 = vld [vmem:[#allocation8 + $0xd4] ss:$8 sps:$4 sm:$0xff]  }
  0xa9   :  { %938 = vmatprep.subr.bf16.mxu0 %v2115_v45  ;;  %1217 = vmatpush1.bf16.msra.mxu1 %v2150_v61  ;;  %v2222_v45 = vld [vmem:[#allocation8 + $0xd0] ss:$8 sps:$4 sm:$0xff]  }
  0xaa   :  { %1218 = vmatprep.subr.bf16.mxu1 %v2155_v62 }
  0xac   :  { %939 = vmatpush2.bf16.msra.mxu0 %v2113_v46  ;;  %v2227_v46 = vld [vmem:[#allocation8 + $0xc4] ss:$8 sps:$4 sm:$0xff]  }
  0xad   :  { %940 = vmatprep.subr.bf16.mxu0 %v2121_v47  ;;  %1219 = vmatpush1.bf16.msra.mxu1 %v2153_v63  ;;  %v2225_v47 = vld [vmem:[#allocation8 + $0xc0] ss:$8 sps:$4 sm:$0xff]  }
  0xae   :  { %1220 = vmatprep.subr.bf16.mxu1 %v2158_v0 }
  0xb0   :  { %941 = vmatpush2.bf16.msra.mxu0 %v2119_v48  ;;  %v2230_v48 = vld [vmem:[#allocation8 + $0xb4] ss:$8 sps:$4 sm:$0xff]  }
  0xb1   :  { %942 = vmatprep.subr.bf16.mxu0 %v2127_v49  ;;  %1221 = vmatpush1.bf16.msra.mxu1 %v2156_v1  ;;  %v2228_v49 = vld [vmem:[#allocation8 + $0xb0] ss:$8 sps:$4 sm:$0xff]  }
  0xb2   :  { %1222 = vmatprep.subr.bf16.mxu1 %v2161_v2 }
  0xb4   :  { %943 = vmatpush2.bf16.msra.mxu0 %v2125_v50  ;;  %v224_v50 = vlaneseq }
  0xb5   :  { %944 = vmatprep.subr.bf16.mxu0 %v2133_v51  ;;  %1223 = vmatpush1.bf16.msra.mxu1 %v2159_v3 }
  0xb6   :  { %1224 = vmatprep.subr.bf16.mxu1 %v2164_v4 }
  0xb8   :  { %945 = vmatpush2.bf16.msra.mxu0 %v2131_v52  ;;  %v225_v52 = vshrl.u32 %v224_v50, 7 }
  0xb9   :  { %946 = vmatprep.subr.bf16.mxu0 %v2139_v53  ;;  %1225 = vmatpush1.bf16.msra.mxu1 %v2162_v5 }
  0xba   :  { %1226 = vmatprep.subr.bf16.mxu1 %v2167_v6  ;;  %v2484_v57 = vsub.s32 0, %v225_v52 }
  0xbc   :  { %947 = vmatpush2.bf16.msra.mxu0 %v2137_v54  ;;  %v227_v61 = vrot.slane %v222_v56, %v2484_v57 }
  0xbd   :  { %1227 = vmatpush1.bf16.msra.mxu1 %v2165_v7  ;;  %1465 = vmatprep.subr.bf16.mxu0 %v2194_v25 }
  0xbe   :  { %1228 = vmatprep.subr.bf16.mxu1 %v2170_v8 }
  0xbf   :  { %949 = vmatmul.mubr.bf16.vlgmr.msra.gmra.mxu0 %v2141_v55  ;;  %v2479_v55 = vsub.s32 1, %v225_v52 }
  0xc0   :  { %1466 = vmatpush1.bf16.msra.mxu0 %v2192_v24 }
  0xc1   :  { %1229 = vmatpush2.bf16.msra.mxu1 %v2168_v9  ;;  %1467 = vmatprep.subr.bf16.mxu0 %v2197_v26  ;;  %v231_v60 = vrot.slane %v222_v56, %v2479_v55 }
  0xc2   :  { %1230 = vmatprep.subr.bf16.mxu1 %v2173_v10 }
  0xc4   :  { %1468 = vmatpush1.bf16.msra.mxu0 %v2195_v27 }
  0xc5   :  { %1231 = vmatpush2.bf16.msra.mxu1 %v2171_v11  ;;  %1469 = vmatprep.subr.bf16.mxu0 %v2200_v28 }
  0xc6   :  { %1232 = vmatprep.subr.bf16.mxu1 %v2176_v12 }
  0xc8   :  { %1470 = vmatpush1.bf16.msra.mxu0 %v2198_v29 }
  0xc9   :  { %1233 = vmatpush2.bf16.msra.mxu1 %v2174_v13  ;;  %1471 = vmatprep.subr.bf16.mxu0 %v2203_v30 }
  0xca   :  { %1234 = vmatprep.subr.bf16.mxu1 %v2179_v14 }
  0xcc   :  { %1472 = vmatpush1.bf16.msra.mxu0 %v2201_v31  ;;  %v2233_v31 = vld [vmem:[#allocation8 + $0xa4] ss:$8 sps:$4 sm:$0xff]  }
  0xcd   :  { %1235 = vmatpush2.bf16.msra.mxu1 %v2177_v15  ;;  %1473 = vmatprep.subr.bf16.mxu0 %v2206_v32  ;;  %v2231_v32 = vld [vmem:[#allocation8 + $0xa0] ss:$8 sps:$4 sm:$0xff]  }
  0xce   :  { %1236 = vmatprep.subr.bf16.mxu1 %v2182_v16 }
  0xd0   :  { %1474 = vmatpush1.bf16.msra.mxu0 %v2204_v33  ;;  %v2236_v33 = vld [vmem:[#allocation8 + $0x94] ss:$8 sps:$4 sm:$0xff]  }
  0xd1   :  { %1237 = vmatpush2.bf16.msra.mxu1 %v2180_v17  ;;  %1475 = vmatprep.subr.bf16.mxu0 %v2209_v34  ;;  %v2234_v34 = vld [vmem:[#allocation8 + $0x90] ss:$8 sps:$4 sm:$0xff]  }
  0xd2   :  { %1238 = vmatprep.subr.bf16.mxu1 %v2185_v18 }
  0xd4   :  { %1476 = vmatpush1.bf16.msra.mxu0 %v2207_v35  ;;  %v2239_v35 = vld [vmem:[#allocation8 + $0x84] ss:$8 sps:$4 sm:$0xff]  }
  0xd5   :  { %1239 = vmatpush2.bf16.msra.mxu1 %v2183_v19  ;;  %1477 = vmatprep.subr.bf16.mxu0 %v2212_v36  ;;  %v2237_v36 = vld [vmem:[#allocation8 + $0x80] ss:$8 sps:$4 sm:$0xff]  }
  0xd6   :  { %1240 = vmatprep.subr.bf16.mxu1 %v2188_v20 }
  0xd8   :  { %1478 = vmatpush1.bf16.msra.mxu0 %v2210_v37  ;;  %v2240_v37 = vld [vmem:[#allocation10 + $0x78] sm:$0xff]  }
  0xd9   :  { %1241 = vmatpush2.bf16.msra.mxu1 %v2186_v21  ;;  %1479 = vmatprep.subr.bf16.mxu0 %v2215_v38  ;;  %v2241_v38 = vld [vmem:[#allocation10 + $0x38] sm:$0xff]  }
  0xda   :  { %1242 = vmatprep.subr.bf16.mxu1 %v2191_v22 }
  0xdc   :  { %1480 = vmatpush1.bf16.msra.mxu0 %v2213_v39  ;;  %v2242_v39 = vld [vmem:[#allocation10 + $0x70] sm:$0xff]  }
  0xdd   :  { %1243 = vmatpush2.bf16.msra.mxu1 %v2189_v23  ;;  %1481 = vmatprep.subr.bf16.mxu0 %v2218_v40  ;;  %v2243_v40 = vld [vmem:[#allocation10 + $0x30] sm:$0xff]  }
  0xde   :  { %1931 = vmatprep.subr.bf16.mxu1 %v2240_v37 }
  0xe0   :  { %1482 = vmatpush2.bf16.msra.mxu0 %v2216_v41  ;;  %v2244_v41 = vld [vmem:[#allocation10 + $0x68] sm:$0xff]  }
  0xe1   :  { %1483 = vmatprep.subr.bf16.mxu0 %v2221_v42  ;;  %v2245_v42 = vld [vmem:[#allocation10 + $0x28] sm:$0xff]  }
  0xe4   :  { %1484 = vmatpush2.bf16.msra.mxu0 %v2219_v43  ;;  %v2246_v43 = vld [vmem:[#allocation10 + $0x60] sm:$0xff]  }
  0xe5   :  { %1485 = vmatprep.subr.bf16.mxu0 %v2224_v44  ;;  %v2247_v44 = vld [vmem:[#allocation10 + $0x20] sm:$0xff]  }
  0xe8   :  { %1486 = vmatpush2.bf16.msra.mxu0 %v2222_v45  ;;  %v2248_v45 = vld [vmem:[#allocation10 + $0x58] sm:$0xff]  }
  0xe9   :  { %1487 = vmatprep.subr.bf16.mxu0 %v2227_v46  ;;  %v2249_v46 = vld [vmem:[#allocation10 + $0x18] sm:$0xff]  }
  0xec   :  { %1488 = vmatpush2.bf16.msra.mxu0 %v2225_v47  ;;  %v1040_v47 = vld [vmem:[%s2511_s4] sm:$0x3] }
  0xed   :  { %1489 = vmatprep.subr.bf16.mxu0 %v2230_v48  ;;  %v1045_v50 = vrot.slane %v1040_v47, %v2484_v57 }
  0xf0   :  { %1490 = vmatpush2.bf16.msra.mxu0 %v2228_v49  ;;  %v1049_v49 = vrot.slane %v1040_v47, %v2479_v55 }
  0xf1   :  { %1491 = vmatprep.subr.bf16.mxu0 %v2233_v31 }
  0xf4   :  { %1492 = vmatpush2.bf16.msra.mxu0 %v2231_v32 }
  0xf5   :  { %1493 = vmatprep.subr.bf16.mxu0 %v2236_v33 }
  0xf8   :  { %1494 = vmatpush2.bf16.msra.mxu0 %v2234_v34 }
  0xf9   :  { %1495 = vmatprep.subr.bf16.mxu0 %v2239_v35 }
  0xfc   :  { %1496 = vmatpush2.bf16.msra.mxu0 %v2237_v36 }
 0x13f   :  { %v864_v53 = vpop.f32.mrf.mxu0 }
 0x140   :  { %v907_v51 = vpop.f32.mrf.mxu1  ;;  %v865_v2 = vadd.f32 %v864_v53, %v227_v61 }
 0x141   :  { %v866_v58 = vpop.f32.mrf.mxu0 }
 0x142   :  { %v909_v54 = vpop.f32.mrf.mxu1  ;;  %v867_v1 = vadd.f32 %v866_v58, %v231_v60  ;;  %v908_v9 = vadd.f32 %v907_v51, %v865_v2  ;;  %v2250_v2 = vld [vmem:[#allocation10 + $0x50] sm:$0xff]  }
 0x143   :  { %v868_v62 = vpop.f32.mrf.mxu0 }
 0x144   :  { %v911_v59 = vpop.f32.mrf.mxu1  ;;  %v869_v4 = vadd.f32 %v868_v62, %v227_v61  ;;  %v910_v7 = vadd.f32 %v909_v54, %v867_v1 }
 0x145   :  { %v870_v3 = vpop.f32.mrf.mxu0 }
 0x146   :  { %v913_v63 = vpop.f32.mrf.mxu1  ;;  %v871_v8 = vadd.f32 %v870_v3, %v231_v60  ;;  %v912_v11 = vadd.f32 %v911_v59, %v869_v4  ;;  %v2251_v3 = vld [vmem:[#allocation10 + $0x10] sm:$0xff]   ;;  %v2252_v4 = vld [vmem:[#allocation10 + $0x48] sm:$0xff]  }
 0x148   :  { %v914_v16 = vadd.f32 %v913_v63, %v871_v8  ;;  %v1293_v8 = vld [vmem:[%s2513_s6] sm:$0x3] }
 0x160   :  { %v993_v0 = vpop.f32.mrf.mxu1 }
 0x162   :  { %v995_v5 = vpop.f32.mrf.mxu1 }
 0x164   :  { %v997_v14 = vpop.f32.mrf.mxu1 }
 0x166   :  { %v999_v23 = vpop.f32.mrf.mxu1 }
 0x17f   :  { %v950_v6 = vpop.f32.mrf.mxu0 }
 0x180   :  { %v951_v13 = vadd.f32 %v950_v6, %v908_v9  ;;  %v2254_v6 = vld [vmem:[#allocation10 + $0x40] sm:$0xff]  }
 0x181   :  { %v952_v10 = vpop.f32.mrf.mxu0 }
 0x182   :  { %v953_v12 = vadd.f32 %v952_v10, %v910_v7  ;;  %v994_v22 = vadd.f32 %v993_v0, %v951_v13  ;;  %v2255_v7 = vld [vmem:[#allocation10] sm:$0xff]   ;;  %v1302_v10 = vrot.slane %v1293_v8, %v2479_v55  ;;  %v1914_v55 = vld [vmem:[%s2515_s8] ss:$0 sm:$0xff]  ;;  %s2404_s8 = smov [#allocation11]  }
 0x183   :  { %v954_v15 = vpop.f32.mrf.mxu0  ;;  %s1717_s21 = sshll.u32 %s2404_s8, 4  ;;  %s1718_s21 = int_to_ptr.vmem [resolvable:$true] %s1717_s21 }
 0x184   :  { %v955_v17 = vadd.f32 %v954_v15, %v912_v11  ;;  %v996_v19 = vadd.f32 %v995_v5, %v953_v12  ;;  %v1002_v28 = vmax.f32 %v994_v22, 0.0  ;;  %v2253_v5 = vld [vmem:[#allocation10 + $0x8] sm:$0xff]   ;;  %v1298_v11 = vrot.slane %v1293_v8, %v2484_v57  ;;  %s2364_s22 = scalar_lea.vmem %s1718_s21, 256  ;;  %p2369_p12 = scmp.lt.s32.totalorder %s1718_s21, %s1718_s21 }
 0x185   :  { %v956_v18 = vpop.f32.mrf.mxu0  ;;  %p2365_p11 = scmp.ne.s32.totalorder %s1718_s21, %s2364_s22  ;;  %p2370_p13 = scmp.lt.s32.totalorder %s2364_s22, %s2364_s22 }
 0x186   :  { %v998_v20 = vadd.f32 %v997_v14, %v955_v17  ;;  %v957_v21 = vadd.f32 %v956_v18, %v914_v16  ;;  %v1003_v26 = vmax.f32 %v996_v19, 0.0 }
 0x187   :  { %p2371_p0 = por %p2370_p13, %p2369_p12 }
 0x188   :  { %v1000_v24 = vadd.f32 %v999_v23, %v957_v21  ;;  %v1004_v25 = vmax.f32 %v998_v20, 0.0 }
 0x189   :  { %p2372_p1 = pnand %p2371_p0, %p2365_p11 }
 0x18a   :  { %v1005_v27 = vmax.f32 %v1000_v24, 0.0  ;;  %v1006_v30 = vpack.c.bf16 %v1004_v25, %v1002_v28 }
 0x18c   :  { %v1007_v29 = vpack.c.bf16 %v1005_v27, %v1003_v26 }
 0x18e   :  { %1244 = vmatprep.mubr.bf16.mxu1 %v1007_v29 }
 0x18f   :  { %1245 = vmatmul.mubr.bf16.vlgmr.msra.gmra.mxu1 %v1006_v30 }
 0x190   :  { %1932 = vmatpush3.bf16.msra.mxu1 %v2241_v38 }
 0x191   :  { %1933 = vmatprep.subr.bf16.mxu1 %v2242_v39 }
 0x194   :  { %1934 = vmatpush3.bf16.msra.mxu1 %v2243_v40 }
 0x195   :  { %1935 = vmatprep.subr.bf16.mxu1 %v2244_v41 }
 0x198   :  { %1936 = vmatpush3.bf16.msra.mxu1 %v2245_v42 }
 0x199   :  { %1937 = vmatprep.subr.bf16.mxu1 %v2246_v43 }
 0x19c   :  { %1938 = vmatpush3.bf16.msra.mxu1 %v2247_v44 }
 0x19d   :  { %1939 = vmatprep.subr.bf16.mxu1 %v2248_v45 }
 0x1a0   :  { %1940 = vmatpush3.bf16.msra.mxu1 %v2249_v46 }
 0x1a1   :  { %1941 = vmatprep.subr.bf16.mxu1 %v2250_v2 }
 0x1a4   :  { %1942 = vmatpush3.bf16.msra.mxu1 %v2251_v3 }
 0x1a5   :  { %1943 = vmatprep.subr.bf16.mxu1 %v2252_v4 }
 0x1a8   :  { %1944 = vmatpush3.bf16.msra.mxu1 %v2253_v5 }
 0x1a9   :  { %1945 = vmatprep.subr.bf16.mxu1 %v2254_v6 }
 0x1ac   :  { %1946 = vmatpush3.bf16.msra.mxu1 %v2255_v7 }
 0x24f   :  { %v1246_v48 = vpop.f32.mrf.mxu1 }
 0x250   :  { %v1247_v56 = vadd.f32 %v1246_v48, %v1045_v50 }
 0x251   :  { %v1248_v51 = vpop.f32.mrf.mxu1 }
 0x252   :  { %v1249_v53 = vadd.f32 %v1248_v51, %v1049_v49  ;;  %v1255_v63 = vmax.f32 %v1247_v56, 0.0 }
 0x253   :  { %v1250_v52 = vpop.f32.mrf.mxu1 }
 0x254   :  { %v1251_v54 = vadd.f32 %v1250_v52, %v1045_v50  ;;  %v1256_v61 = vmax.f32 %v1249_v53, 0.0 }
 0x255   :  { %v1252_v58 = vpop.f32.mrf.mxu1 }
 0x256   :  { %v1253_v59 = vadd.f32 %v1252_v58, %v1049_v49  ;;  %v1257_v60 = vmax.f32 %v1251_v54, 0.0 }
 0x258   :  { %v1258_v62 = vmax.f32 %v1253_v59, 0.0  ;;  %v1259_v1 = vpack.c.bf16 %v1257_v60, %v1255_v63 }
 0x25a   :  { %v1260_v0 = vpack.c.bf16 %v1258_v62, %v1256_v61 }
 0x25c   :  { %1497 = vmatprep.mubr.bf16.mxu0 %v1260_v0 }
 0x25d   :  { %1498 = vmatmul.mubr.bf16.vlgmr.msra.gmra.mxu0 %v1259_v1 }
 0x31d   :  { %v1499_v9 = vpop.f32.mrf.mxu0 }
 0x31e   :  { %v1500_v16 = vadd.f32 %v1499_v9, %v1298_v11 }
 0x31f   :  { %v1501_v12 = vpop.f32.mrf.mxu0 }
 0x320   :  { %v1502_v14 = vadd.f32 %v1501_v12, %v1302_v10  ;;  %v1508_v22 = vmax.f32 %v1500_v16, 0.0 }
 0x321   :  { %v1503_v13 = vpop.f32.mrf.mxu0 }
 0x322   :  { %v1504_v15 = vadd.f32 %v1503_v13, %v1298_v11  ;;  %v1509_v20 = vmax.f32 %v1502_v14, 0.0 }
 0x323   :  { %v1505_v17 = vpop.f32.mrf.mxu0 }
 0x324   :  { %v1506_v18 = vadd.f32 %v1505_v17, %v1302_v10  ;;  %v1510_v19 = vmax.f32 %v1504_v15, 0.0 }
 0x326   :  { %v1511_v21 = vmax.f32 %v1506_v18, 0.0  ;;  %v1512_v24 = vpack.c.bf16 %v1510_v19, %v1508_v22 }
 0x328   :  { %v1513_v23 = vpack.c.bf16 %v1511_v21, %v1509_v20 }
 0x32a   :  { %1681 = vmatprep.mubr.bf16.mxu1 %v1513_v23 }
 0x32b   :  { %1682 = vmatmul.mubr.bf16.vlgmr.msra.gmra.mxu1 %v1512_v24 }
 0x3eb   :  { %v1947_v25 = vpop.f32.mrf.mxu1 }
 0x3ed   :  { %v1948_v26 = vpop.f32.mrf.mxu1 }
 0x3ee   :  { %v1949_v57 = vadd.f32 %v1948_v26, %v1947_v25 }
 0x3ef   :  { %v1950_v27 = vpop.f32.mrf.mxu1 }
 0x3f0   :  { %v1684_v28 = vadd.f32 %v1949_v57, %v1914_v55 }
 0x3f1   :  { %v1951_v29 = vpop.f32.mrf.mxu1 }
 0x3f2   :  { %v1952_v30 = vadd.f32 %v1951_v29, %v1950_v27  ;;  %1690 = vmax.xlane.f32.xlu0 %v1684_v28 }
 0x3f4   :  { %v1687_v31 = vadd.f32 %v1952_v30, %v1914_v55 }
 0x3f6   :  { %1692 = vmax.xlane.f32.xlu0 %v1687_v31 }
 0x47b   :  { %v1691_v32 = vpop.xlane.xlu0 %1690 }
 0x47c   :  { %v1694_v33 = vsub.f32 %v1684_v28, %v1691_v32 }
 0x47e   :  { %v1696_v34 = vmul.f32 1.442695, %v1694_v33 }
 0x47f   :  { %v1693_v35 = vpop.xlane.xlu0 %1692 }
 0x480   :  { %v1695_v36 = vsub.f32 %v1687_v31, %v1693_v35  ;;  %2256 = vpow2.f32 %v1696_v34 }
 0x482   :  { %v1698_v37 = vmul.f32 1.442695, %v1695_v36 }
 0x484   :  { %2258 = vpow2.f32 %v1698_v37 }
 0x48d   :  { %v2257_v38 = vpop.eup %2256 }
 0x48e   :  { %1700 = vadd.xlane.f32.xlu1 %v2257_v38 }
 0x491   :  { %v2259_v39 = vpop.eup %2258 }
 0x492   :  { %1702 = vadd.xlane.f32.xlu1 %v2259_v39 }
 0x517   :  { %v1701_v40 = vpop.xlane.xlu1 %1700 }
 0x518   :  { %2260 = vlog2.f32 %v1701_v40 }
 0x51b   :  { %v1703_v41 = vpop.xlane.xlu1 %1702 }
 0x51c   :  { %2262 = vlog2.f32 %v1703_v41 }
 0x525   :  { %v2261_v42 = vpop.eup %2260 }
 0x526   :  { %v1705_v43 = vmul.f32 0.6931472, %v2261_v42 }
 0x528   :  { %v1708_v44 = vsub.f32 %v1694_v33, %v1705_v43 }
 0x529   :  { %v2263_v45 = vpop.eup %2262 }
 0x52a   :  { %v1707_v46 = vmul.f32 0.6931472, %v2263_v45  ;;  %1710 = vst [vmem:[#allocation11] sm:$0xff] %v1708_v44 }
 0x52c   :  { %v1709_v47 = vsub.f32 %v1695_v36, %v1707_v46 }
 0x52e   :  { %1711 = vst [vmem:[#allocation11 + $0x8] sm:$0xff] %v1709_v47 }
 0x52f   :  { %2375 = shalt.err (!%p2372_p1)
}
 0x530   :  { %1723 = dma.vmem_to_hbm [thread:$0]  %s1718_s21, 256, %s2516_s9, [#allocation4], %s2393_s12, %s2393_s12, %s2394_s13  }
 0x531   :  { %2390 = dma.done.wait [#allocation4], 256  }
 0x532   :  { %2391 = vsyncadd [#allocation4], 4294967040 }
 0x533   :  { %1727 = vsyncpa [#allocation3], 1 }
 0x534   :  { %1728 = vsyncpa [#allocation6], 1 }
 0x535   :  { %1729 = vsyncpa [#allocation9], 1 }
 0x536   :  { %1730 = vsyncpa [#allocation4], 1 }

</bundles_post_ra>
